<compile_context>
chip_gen: v7x
topology: tpu7x:2x2x1
jax: 0.10.0
libtpu: 0.0.40
codegen_flags: <defaults>
</compile_context>

<pallas_src>
import functools

import jax
import jax.numpy as jnp
from jax.experimental import pallas as pl
from jax.experimental.pallas import tpu as pltpu


def _round_up(a, b):
    return ((a + b - 1) // b) * b


def _first_n_step_loss_kernel(x_ref, y_ref, o_ref, *, k):
    # x_ref: (TB, F) float (native dtype), y_ref: (TB, 1) int32, o_ref: (TB, 1) f32
    x = x_ref[...]                                            # native dtype, no upcast
    y = y_ref[...]                                            # (TB, 1) int32
    tb, f = x.shape

    # Shared row max, single exp pass.
    m_all = jnp.max(x, axis=-1, keepdims=True)                # (TB, 1)
    e = jnp.exp(x - m_all)                                    # (TB, F)

    # Target-class window mask: lanes [y*k, y*k + k) via one unsigned compare.
    lane = jax.lax.broadcasted_iota(jnp.int32, (tb, f), 1)    # (TB, F)
    in_win = (lane - y * k).astype(jnp.uint32) < jnp.uint32(k)

    # Row sums, accumulated in f32.
    sum_all = jnp.sum(e, axis=-1, keepdims=True, dtype=jnp.float32)
    sum_sel = jnp.sum(jnp.where(in_win, e, 0.0), axis=-1, keepdims=True,
                      dtype=jnp.float32)

    # loss = log_z - picked = log(sum_all) - log(sum_sel)   (shared max cancels).
    o_ref[...] = (jnp.log(sum_all) - jnp.log(sum_sel)).astype(o_ref.dtype)


def first_n_step_loss(x, y, num_classes=5, n_steps=1, block_b=None):
    """x: (B, output_dim * K) float (any float dtype), y: (B,) int. Returns scalar mean CE."""
    output_dim = num_classes ** n_steps
    B, F = x.shape
    assert F % output_dim == 0, (F, output_dim)
    K = F // output_dim

    y2 = jnp.reshape(y.astype(jnp.int32), (B, 1))
    itemsize = jnp.dtype(x.dtype).itemsize
    f_pad = _round_up(F, 128)           # lanes are padded to 128 per vreg row
    b_pad = _round_up(B, 8)

    if block_b is None:
        # VMEM budget: double-buffered input block (native dtype) + ~4 (TB, F)-sized
        # 32-bit intermediates (exp result / iota / mask / select) live in the body.
        # 12 MiB keeps us under the v5e 16 MiB scoped default with headroom.
        budget = 12 * 1024 * 1024
        per_row_bytes = f_pad * (2 * itemsize + 4 * 4)
        tb = max(8, min(budget // per_row_bytes, 512))   # tb>=256 already amortizes
        tb = (tb // 8) * 8                                # per-step overhead for wide F
        tb = min(tb, b_pad)
        # Keep >= 2 grid blocks whenever the batch allows, so ("parallel",) actually
        # feeds both TensorCores on v7x.
        if b_pad >= 16:
            tb = min(tb, _round_up(pl.cdiv(b_pad, 2), 8))
    else:
        tb = block_b
    grid = (pl.cdiv(B, tb),)

    per_row = pl.pallas_call(
        functools.partial(_first_n_step_loss_kernel, k=K),
        out_shape=jax.ShapeDtypeStruct((B, 1), jnp.float32),
        grid=grid,
        in_specs=[
            pl.BlockSpec((tb, F), lambda i: (i, 0)),   # lane-dense logits block
            pl.BlockSpec((tb, 1), lambda i: (i, 0)),   # targets
        ],
        out_specs=pl.BlockSpec((tb, 1), lambda i: (i, 0)),
        compiler_params=pltpu.CompilerParams(
            dimension_semantics=("parallel",),
        ),
        cost_estimate=pl.CostEstimate(
            flops=5 * B * F,
            transcendentals=B * F,          # one exp per element (+2 logs/row, noise)
            bytes_accessed=B * F * itemsize + B * 4 + B * 4,
        ),
    )(x, y2)

    # Mean over the true batch (OOB rows of a ragged last block are never written).
    return jnp.mean(per_row)


def _reference(x, y, num_classes=5, n_steps=1):
    output_dim = num_classes ** n_steps
    B = x.shape[0]
    x3 = jnp.reshape(x, (B, output_dim, -1)).astype(jnp.float32)
    logits = jax.scipy.special.logsumexp(x3, axis=-1)
    log_z = jax.scipy.special.logsumexp(logits, axis=-1)
    picked = jnp.take_along_axis(logits, y.astype(jnp.int32)[:, None], axis=-1)[:, 0]
    return jnp.mean(log_z - picked)


if __name__ == "__main__":
    key = jax.random.PRNGKey(0)

    # Case 1/2: module defaults (num_classes=5, n_steps=1, K=5 => F=25), f32.
    # B=8 exercises a single aligned block; B=13 a ragged multi-block grid.
    num_classes, n_steps = 5, 1
    output_dim = num_classes ** n_steps
    K = num_classes
    for B in (8, 13):
        kx, ky, key = jax.random.split(key, 3)
        x = jax.random.normal(kx, (B, output_dim * K), dtype=jnp.float32)
        y = jax.random.randint(ky, (B,), 0, output_dim, dtype=jnp.int32)

        loss = first_n_step_loss(x, y, num_classes=num_classes, n_steps=n_steps)
        loss = jax.block_until_ready(loss)

        ref = _reference(x, y, num_classes=num_classes, n_steps=n_steps)
        assert jnp.allclose(loss, ref, rtol=1e-5, atol=1e-5), (B, loss, ref)

    # Case 3: bf16 HBM stream, n_steps=2 (output_dim=25, F=125), B=16 (2 grid blocks).
    num_classes, n_steps = 5, 2
    output_dim = num_classes ** n_steps
    K = num_classes
    B = 16
    kx, ky, key = jax.random.split(key, 3)
    x = jax.random.normal(kx, (B, output_dim * K), dtype=jnp.bfloat16)
    y = jax.random.randint(ky, (B,), 0, output_dim, dtype=jnp.int32)

    loss = first_n_step_loss(x, y, num_classes=num_classes, n_steps=n_steps)
    loss = jax.block_until_ready(loss)
    ref = _reference(x, y, num_classes=num_classes, n_steps=n_steps)
    assert jnp.allclose(loss, ref, rtol=5e-2, atol=5e-2), (B, loss, ref)

    print("KERNEL_OK")
</pallas_src>

<mosaic_0001>
module attributes {stable_mosaic.version = 11 : i64} {
  func.func @_first_n_step_loss_kernel(%arg0: i32, %arg1: memref<8x25xf32, #tpu.memory_space<vmem>>, %arg2: memref<8x1xi32, #tpu.memory_space<vmem>>, %arg3: memref<8x1xf32, #tpu.memory_space<vmem>>) attributes {dimension_semantics = [#tpu.dimension_semantics<parallel>], iteration_bounds = array<i64: 1>, scalar_prefetch = 0 : i64, scratch_operands = 0 : i64, tpu.core_type = #tpu.core_type<tc>, window_params = [{transform_indices = @transform_0, window_bounds = array<i64: 8, 25>}, {transform_indices = @transform_1, window_bounds = array<i64: 8, 1>}, {transform_indices = @transform_2, window_bounds = array<i64: 8, 1>}]} {
    %c0 = arith.constant 0 : index
    %c0_0 = arith.constant 0 : index
    %0 = vector.load %arg1[%c0, %c0_0] : memref<8x25xf32, #tpu.memory_space<vmem>>, vector<8x25xf32>
    %c0_1 = arith.constant 0 : index
    %c0_2 = arith.constant 0 : index
    %1 = vector.load %arg2[%c0_1, %c0_2] : memref<8x1xi32, #tpu.memory_space<vmem>>, vector<8x1xi32>
    %cst = arith.constant dense<0xFF800000> : vector<8xf32>
    %2 = vector.multi_reduction <maximumf>, %0, %cst [1] : vector<8x25xf32> to vector<8xf32>
    %3 = vector.shape_cast %2 : vector<8xf32> to vector<8x1xf32>
    %4 = vector.broadcast %3 : vector<8x1xf32> to vector<8x25xf32>
    %5 = arith.subf %0, %4 : vector<8x25xf32>
    %6 = math.exp %5 : vector<8x25xf32>
    %7 = tpu.iota {dimensions = array<i32: 1>} : vector<8x25xi32>
    %c5_i32 = arith.constant 5 : i32
    %8 = vector.broadcast %c5_i32 : i32 to vector<8x1xi32>
    %9 = arith.muli %1, %8 : vector<8x1xi32>
    %10 = vector.broadcast %9 : vector<8x1xi32> to vector<8x25xi32>
    %11 = arith.subi %7, %10 : vector<8x25xi32>
    %c5_i32_3 = arith.constant 5 : i32
    %12 = vector.broadcast %c5_i32_3 : i32 to vector<8x25xi32>
    %13 = arith.cmpi ult, %11, %12 : vector<8x25xi32>
    %cst_4 = arith.constant dense<0.000000e+00> : vector<8xf32>
    %14 = vector.multi_reduction <add>, %6, %cst_4 [1] : vector<8x25xf32> to vector<8xf32>
    %15 = vector.shape_cast %14 : vector<8xf32> to vector<8x1xf32>
    %cst_5 = arith.constant 0.000000e+00 : f32
    %16 = vector.broadcast %cst_5 : f32 to vector<8x25xf32>
    %17 = arith.select %13, %6, %16 : vector<8x25xi1>, vector<8x25xf32>
    %cst_6 = arith.constant dense<0.000000e+00> : vector<8xf32>
    %18 = vector.multi_reduction <add>, %17, %cst_6 [1] : vector<8x25xf32> to vector<8xf32>
    %19 = vector.shape_cast %18 : vector<8xf32> to vector<8x1xf32>
    %20 = math.log %15 : vector<8x1xf32>
    %21 = math.log %19 : vector<8x1xf32>
    %22 = arith.subf %20, %21 : vector<8x1xf32>
    %c0_7 = arith.constant 0 : index
    %c0_8 = arith.constant 0 : index
    %23 = vector.load %arg3[%c0_7, %c0_8] : memref<8x1xf32, #tpu.memory_space<vmem>>, vector<8x1xf32>
    tpu.vector_store %arg3[%c0_7, %c0_8], %22 {strides = array<i32>} : memref<8x1xf32, #tpu.memory_space<vmem>>, vector<8x1xf32>,
    return
  }
  func.func @transform_0(%arg0: i32) -> (i32, i32) {
    %c0_i32 = arith.constant 0 : i32
    %c0_i32_0 = arith.constant 0 : i32
    return %arg0, %c0_i32 : i32, i32
  }
  func.func @transform_1(%arg0: i32) -> (i32, i32) {
    %c0_i32 = arith.constant 0 : i32
    %c0_i32_0 = arith.constant 0 : i32
    return %arg0, %c0_i32 : i32, i32
  }
  func.func @transform_2(%arg0: i32) -> (i32, i32) {
    %c0_i32 = arith.constant 0 : i32
    %c0_i32_0 = arith.constant 0 : i32
    return %arg0, %c0_i32 : i32, i32
  }
}

</mosaic_0001>

<bundles_post_ra>
// kernel: tpu_custom_call.1
= control target key start
LH: loop header
LB: loop body
LE: loop exit
PB: predicated region body
PF: predicated region fallthrough
CT: control target
= control target key end

     0   :  { %vm13_vm0 = vcmask 203776   ;;  %v54_v1 = vmov 0   ;;  %v20_v7 = vlaneseq  ;;  %vm40_vm2 = vcmask 7168   ;;  %s82_s0 = inlined_call_operand.vmem [shape: f32[8,25], index: 0, kind: input, shape index: {}]   ;;  %s83_s1 = inlined_call_operand.vmem [shape: s32[8,1], index: 1, kind: input, shape index: {}]   ;;  %s84_s2 = inlined_call_operand.vmem [shape: f32[8,1], index: 2, kind: output, shape index: {}]  }
   0x1   :  { %v11_v0 = vld [vmem:[%s82_s0] sm:$0xff]  ;;  %47 = vset.pattern.permute.xlu0 %v54_v1 }
   0x2   :  { %v14_v2 = vsel %vm13_vm0, %v11_v0, -inf  ;;  %v12_v3 = vld [vmem:[%s83_s1] sm:$0xff]  ;;  %v21_v9 = vand.u32 127, %v20_v7 }
   0x3   :  { %15 = vmax.xlane.f32.xlu0 %v14_v2  ;;  %v22_v4 = vmul.u32 5, %v12_v3 }
  0x19   :  { %24 = vperm.xlu0 %47, %v22_v4  }
  0x90   :  { %v16_v5 = vpop.xlane.xlu0 %15 }
  0x91   :  { %v17_v6 = vsub.f32 %v11_v0, %v16_v5 }
  0x93   :  { %v18_v8 = vmul.f32 1.442695, %v17_v6 }
  0x95   :  { %48 = vpow2.f32 %v18_v8 }
  0x98   :  { %v25_v10 = vpop.permute.xlu0 %24 }
  0x99   :  { %v26_v11 = vsub.s32 %v21_v9, %v25_v10 }
  0x9b   :  { %vm27_vm1 = vcmp.lt.u32.totalorder %v26_v11, 5 }
  0x9f   :  { %v49_v12 = vpop.eup %48 }
  0xa0   :  { %v28_v13 = vsel %vm13_vm0, %v49_v12, 0.0  ;;  %v31_v14 = vsel %vm27_vm1, %v49_v12, 0.0 }
  0xa1   :  { %29 = vadd.xlane.f32.xlu1 %v28_v13  ;;  %v32_v15 = vsel %vm13_vm0, %v31_v14, 0.0 }
  0xa5   :  { %33 = vadd.xlane.f32.xlu1 %v32_v15 }
 0x12e   :  { %v30_v16 = vpop.xlane.xlu1 %29 }
 0x12f   :  { %50 = vlog2.f32 %v30_v16 }
 0x132   :  { %v34_v17 = vpop.xlane.xlu1 %33 }
 0x133   :  { %52 = vlog2.f32 %v34_v17 }
 0x139   :  { %v51_v18 = vpop.eup %50 }
 0x13a   :  { %v36_v20 = vmul.f32 0.6931472, %v51_v18 }
 0x13d   :  { %v53_v19 = vpop.eup %52 }
 0x13e   :  { %v38_v21 = vmul.f32 0.6931472, %v53_v19 }
 0x140   :  { %v39_v22 = vsub.f32 %v36_v20, %v38_v21 }
 0x142   :  { %41 = vst.msk [vmem:[%s84_s2] sm:$0xff] %vm40_vm2, %v39_v22 }

</bundles_post_ra>
